<compile_context>
chip_gen: v7x
topology: tpu7x:2x2x1
jax: 0.10.0
libtpu: 0.0.40
codegen_flags: <defaults>
</compile_context>

<pallas_src>
import functools

import jax
import jax.numpy as jnp
from jax.experimental import pallas as pl
from jax.experimental.pallas import tpu as pltpu

H1 = 128     # hidden width of both MLP hidden layers
H_OUT = 64   # bottleneck width (returned h)


def _round_up(x, m):
    return (x + m - 1) // m * m


@functools.lru_cache(maxsize=1)
def _vmem_limit_bytes():
    """Generation-aware VMEM limit: ~3/4 of physical capacity with headroom."""
    try:
        cap = int(pltpu.get_tpu_info().vmem_capacity_bytes)
    except Exception:
        cap = 64 * 1024 * 1024  # conservative fallback == v7x physical VMEM/TC
    return int(min(cap * 3 // 4, 112 * 1024 * 1024))


@functools.lru_cache(maxsize=1)
def _single_buffer_weights_supported():
    """Probe once whether pipeline_mode=pl.Buffered(1) lowers on this jax/Mosaic."""
    def _copy(a_ref, o_ref):
        o_ref[...] = a_ref[...]

    try:
        spec = pl.BlockSpec((8, 128), lambda i: (0, 0),
                            pipeline_mode=pl.Buffered(1))
        fn = pl.pallas_call(
            _copy,
            out_shape=jax.ShapeDtypeStruct((8, 128), jnp.float32),
            grid=(1,),
            in_specs=[spec],
            out_specs=pl.BlockSpec((8, 128), lambda i: (0, 0)),
        )
        jax.block_until_ready(fn(jnp.zeros((8, 128), jnp.float32)))
        return True
    except Exception:
        # Capability probe only — the real kernel is never guarded by this except.
        return False


def _memory_encoder_kernel(x_ref,
                           w1_ref, b1_ref,
                           w2_ref, b2_ref,
                           w23_ref, b23_ref,
                           w4_ref, b4_ref,
                           h_ref, z_ref):
    """Fused encoder+decoder MLP for one batch tile (feature dims fully resident)."""
    cdt = w1_ref.dtype  # MXU operand dtype (f32 or bf16); accumulation stays f32.

    # Encoder layer 1: Linear(D,128) + ReLU.
    a1 = jnp.dot(x_ref[...].astype(cdt), w1_ref[...],
                 preferred_element_type=jnp.float32)
    a1 = jnp.maximum(a1 + b1_ref[...], 0.0)
    a1c = a1.astype(cdt)

    # Encoder layer 2 (the returned code): h = a1 @ W2 + b2.
    h = jnp.dot(a1c, w2_ref[...], preferred_element_type=jnp.float32) + b2_ref[...]

    # Decoder layer 1 pre-activation, folded through the bottleneck (no
    # nonlinearity between W2 and W3):
    #   relu(h @ W3 + b3) == relu(a1 @ (W2 @ W3) + (b2 @ W3 + b3))
    a2 = jnp.dot(a1c, w23_ref[...], preferred_element_type=jnp.float32) + b23_ref[...]
    a2 = jnp.maximum(a2, 0.0)

    # Decoder layer 2 + sigmoid. sigmoid(x) = 0.5*(tanh(x/2)+1): one EUP op.
    logits = jnp.dot(a2.astype(cdt), w4_ref[...],
                     preferred_element_type=jnp.float32) + b4_ref[...]
    z = 0.5 * (jnp.tanh(0.5 * logits) + 1.0)

    h_ref[...] = h.astype(h_ref.dtype)
    z_ref[...] = z.astype(z_ref.dtype)


def _choose_block_b(batch, d, act_bytes):
    """Pick a batch tile: VMEM-bounded, >=4 grid steps when the batch allows."""
    if batch <= 256:
        # One tile: block dim == full batch dim, so no (8, .) alignment needed.
        return batch
    vmem = _vmem_limit_bytes()
    # Double-buffered per-step tiles: x read (f32), z write (act dtype), h write (f32).
    per_row = 2 * (d * 4 + d * act_bytes + H_OUT * 4)
    # Resident weights/biases; count 2x so the double-buffered fallback is also safe.
    w_bytes = 2 * ((d * H1 + H1 * H_OUT + H1 * H1 + H1 * d) * act_bytes
                   + (2 * H1 + H_OUT + d) * 4)
    budget = (vmem * 3) // 4 - w_bytes   # headroom for compiler-internal scratch
    bb = max(budget // per_row, 128)
    bb = min(bb, 1024)                   # big tiles: ~85% of HBM roofline territory
    # Keep >= 4 grid steps when the batch allows: the "parallel" axis shards
    # across v7x's two TensorCores -> >=2 steps/TC so DMAs overlap compute.
    bb = min(bb, _round_up(pl.cdiv(batch, 4), 128))
    bb = max((bb // 128) * 128, 128)
    return int(min(bb, batch))


@functools.partial(
    jax.jit,
    static_argnames=("block_b", "compute_dtype", "single_buffer_weights"))
def _forward_impl(x, params, *, block_b, compute_dtype, single_buffer_weights):
    B, D = x.shape
    grid = (pl.cdiv(B, block_b),)
    cdt = jnp.dtype(compute_dtype)

    # Weights in compute dtype; biases stay f32 (added post-accumulation).
    w1 = params["w1"].astype(cdt)                      # (D, 128)
    w2 = params["w2"].astype(cdt)                      # (128, 64)
    w4 = params["w4"].astype(cdt)                      # (128, D)
    w23 = (params["w2"] @ params["w3"]).astype(cdt)    # (128, 128) folded W2@W3
    b23 = params["b2"] @ params["w3"] + params["b3"]   # (1, 128)   folded bias
    b1, b2, b4 = params["b1"], params["b2"], params["b4"]

    def const_spec(shape):
        # Constant index_map -> block never re-DMA'd; a second buffer is wasted
        # VMEM, so request single-buffering when this jax/Mosaic supports it.
        if single_buffer_weights:
            return pl.BlockSpec(shape, lambda i: (0, 0),
                                pipeline_mode=pl.Buffered(1))
        return pl.BlockSpec(shape, lambda i: (0, 0))

    act_bytes = cdt.itemsize
    flops = 2 * B * (D * H1 + H1 * H_OUT + H1 * H1 + H1 * D)
    bytes_accessed = (B * D * x.dtype.itemsize                         # x read
                      + B * D * act_bytes                              # z write
                      + B * H_OUT * 4                                  # h write
                      + (D * H1 + H1 * H_OUT + H1 * H1 + H1 * D) * act_bytes
                      + (2 * H1 + H_OUT + D) * 4)                      # weights+biases
    cost = pl.CostEstimate(flops=flops, transcendentals=B * D,
                           bytes_accessed=bytes_accessed)

    h, z = pl.pallas_call(
        _memory_encoder_kernel,
        out_shape=(
            jax.ShapeDtypeStruct((B, H_OUT), jnp.float32),  # h at true width 64
            jax.ShapeDtypeStruct((B, D), cdt),              # z at true width D
        ),
        grid_spec=pltpu.PrefetchScalarGridSpec(
            num_scalar_prefetch=0,
            grid=grid,
            in_specs=[
                pl.BlockSpec((block_b, D), lambda i: (i, 0)),   # x, unpadded
                const_spec(w1.shape), const_spec(b1.shape),
                const_spec(w2.shape), const_spec(b2.shape),
                const_spec(w23.shape), const_spec(b23.shape),
                const_spec(w4.shape), const_spec(b4.shape),
            ],
            out_specs=[
                pl.BlockSpec((block_b, H_OUT), lambda i: (i, 0)),
                pl.BlockSpec((block_b, D), lambda i: (i, 0)),
            ],
        ),
        compiler_params=pltpu.CompilerParams(
            dimension_semantics=("parallel",),
            vmem_limit_bytes=_vmem_limit_bytes(),
        ),
        cost_estimate=cost,
    )(x, w1, b1, w2, b2, w23, b23, w4, b4)

    return h, z


def memory_encoder_forward(x, params, *, block_b=None, compute_dtype=jnp.float32):
    """x: [B, D]. Returns (h [B, 64] float32, z [B, D] compute_dtype).

    compute_dtype=jnp.bfloat16 halves z/weight HBM traffic and uses the bf16 MXU
    with f32 accumulation (recommended on v5e); x stays in the caller's dtype and
    is only rounded as an in-kernel MXU operand.
    """
    B, D = x.shape
    act_bytes = jnp.dtype(compute_dtype).itemsize
    if block_b is None:
        block_b = _choose_block_b(B, D, act_bytes)
    block_b = int(min(block_b, B))
    used = {k: params[k] for k in
            ("w1", "b1", "w2", "b2", "w3", "b3", "w4", "b4")}
    return _forward_impl(
        x, used,
        block_b=block_b,
        compute_dtype=jnp.dtype(compute_dtype),
        single_buffer_weights=_single_buffer_weights_supported())


def init_params(key, dimensionality):
    """Deterministic init matching nn.Linear shapes (weights stored as [in, out])."""
    def linear(key, fan_in, fan_out):
        kw, kb = jax.random.split(key)
        bound = 1.0 / jnp.sqrt(fan_in)
        w = jax.random.uniform(kw, (fan_in, fan_out), jnp.float32, -bound, bound)
        b = jax.random.uniform(kb, (1, fan_out), jnp.float32, -bound, bound)
        return w, b

    keys = jax.random.split(key, 5)
    w1, b1 = linear(keys[0], dimensionality, 128)   # encoder[0]
    w2, b2 = linear(keys[1], 128, 64)               # encoder[2]
    w3, b3 = linear(keys[2], 64, 128)               # decoder[0]
    w4, b4 = linear(keys[3], 128, dimensionality)   # decoder[2]
    # predictor Linear(D,1) — initialized for parity, unused in forward()
    wp, bp = linear(keys[4], dimensionality, 1)
    return {
        "w1": w1, "b1": b1, "w2": w2, "b2": b2,
        "w3": w3, "b3": b3, "w4": w4, "b4": b4,
        "wp": wp, "bp": bp,
    }


def reference_forward(x, p):
    a1 = jnp.maximum(x @ p["w1"] + p["b1"], 0.0)
    h = a1 @ p["w2"] + p["b2"]
    a2 = jnp.maximum(h @ p["w3"] + p["b3"], 0.0)
    z = jax.nn.sigmoid(a2 @ p["w4"] + p["b4"])
    return h, z


if __name__ == "__main__":
    key = jax.random.PRNGKey(0)
    k_x, k_p = jax.random.split(key)

    batch = 512            # large enough that grid >= 4 (pipelining + v7x megacore)
    dimensionality = 32    # deliberately not lane-aligned; kernel keeps D unpadded

    x = jax.random.normal(k_x, (batch, dimensionality), jnp.float32)
    params = init_params(k_p, dimensionality)

    # f32 path: matches the PyTorch reference semantics (slightly looser tol on z
    # only because W2@W3 is folded in the wrapper -> different f32 summation order).
    h, z = memory_encoder_forward(x, params)
    jax.block_until_ready((h, z))
    h_ref, z_ref = reference_forward(x, params)
    assert h.shape == (batch, 64) and z.shape == (batch, dimensionality)
    assert jnp.allclose(h, h_ref, atol=1e-5, rtol=1e-5)
    assert jnp.allclose(z, z_ref, atol=2e-5, rtol=2e-5)

    # bf16 fast path: bf16 MXU operands + bf16 z writeback, f32 accumulation.
    h_bf, z_bf = memory_encoder_forward(x, params, compute_dtype=jnp.bfloat16)
    jax.block_until_ready((h_bf, z_bf))
    assert jnp.allclose(h_bf.astype(jnp.float32), h_ref, atol=3e-2, rtol=3e-2)
    assert jnp.allclose(z_bf.astype(jnp.float32), z_ref, atol=3e-2, rtol=3e-2)

    print("KERNEL_OK")
</pallas_src>

<mosaic_0001>
module attributes {stable_mosaic.version = 11 : i64} {
  func.func @_copy(%arg0: i32, %arg1: memref<8x128xf32, #tpu.memory_space<vmem>>, %arg2: memref<8x128xf32, #tpu.memory_space<vmem>>) attributes {dimension_semantics = [#tpu.dimension_semantics<arbitrary>], iteration_bounds = array<i64: 1>, scalar_prefetch = 0 : i64, scratch_operands = 0 : i64, tpu.core_type = #tpu.core_type<tc>, window_params = [{pipeline_mode = #tpu.pipeline_mode<synchronous>, transform_indices = @transform_0, window_bounds = array<i64: 8, 128>}, {pipeline_mode = #tpu.pipeline_mode<synchronous>, transform_indices = @transform_1, window_bounds = array<i64: 8, 128>}]} {
    %c0 = arith.constant 0 : index
    %c0_0 = arith.constant 0 : index
    %0 = vector.load %arg1[%c0, %c0_0] : memref<8x128xf32, #tpu.memory_space<vmem>>, vector<8x128xf32>
    %c0_1 = arith.constant 0 : index
    %c0_2 = arith.constant 0 : index
    %1 = vector.load %arg2[%c0_1, %c0_2] : memref<8x128xf32, #tpu.memory_space<vmem>>, vector<8x128xf32>
    tpu.vector_store %arg2[%c0_1, %c0_2], %0 {strides = array<i32>} : memref<8x128xf32, #tpu.memory_space<vmem>>, vector<8x128xf32>,
    return
  }
  func.func @transform_0(%arg0: i32) -> (i32, i32) {
    %c0_i32 = arith.constant 0 : i32
    %c0_i32_0 = arith.constant 0 : i32
    %c0_i32_1 = arith.constant 0 : i32
    return %c0_i32, %c0_i32_0 : i32, i32
  }
  func.func @transform_1(%arg0: i32) -> (i32, i32) {
    %c0_i32 = arith.constant 0 : i32
    %c0_i32_0 = arith.constant 0 : i32
    %c0_i32_1 = arith.constant 0 : i32
    return %c0_i32, %c0_i32_0 : i32, i32
  }
}

module attributes {stable_mosaic.version = 11 : i64} {
  func.func @_memory_encoder_kernel(%arg0: i32, %arg1: memref<128x32xf32, #tpu.memory_space<vmem>>, %arg2: memref<32x128xf32, #tpu.memory_space<vmem>>, %arg3: memref<1x128xf32, #tpu.memory_space<vmem>>, %arg4: memref<128x64xf32, #tpu.memory_space<vmem>>, %arg5: memref<1x64xf32, #tpu.memory_space<vmem>>, %arg6: memref<128x128xf32, #tpu.memory_space<vmem>>, %arg7: memref<1x128xf32, #tpu.memory_space<vmem>>, %arg8: memref<128x32xf32, #tpu.memory_space<vmem>>, %arg9: memref<1x32xf32, #tpu.memory_space<vmem>>, %arg10: memref<128x64xf32, #tpu.memory_space<vmem>>, %arg11: memref<128x32xf32, #tpu.memory_space<vmem>>) attributes {dimension_semantics = [#tpu.dimension_semantics<parallel>], iteration_bounds = array<i64: 4>, scalar_prefetch = 0 : i64, scratch_operands = 0 : i64, tpu.core_type = #tpu.core_type<tc>, window_params = [{transform_indices = @transform_0, window_bounds = array<i64: 128, 32>}, {pipeline_mode = #tpu.pipeline_mode<synchronous>, transform_indices = @transform_1, window_bounds = array<i64: 32, 128>}, {pipeline_mode = #tpu.pipeline_mode<synchronous>, transform_indices = @transform_2, window_bounds = array<i64: 1, 128>}, {pipeline_mode = #tpu.pipeline_mode<synchronous>, transform_indices = @transform_3, window_bounds = array<i64: 128, 64>}, {pipeline_mode = #tpu.pipeline_mode<synchronous>, transform_indices = @transform_4, window_bounds = array<i64: 1, 64>}, {pipeline_mode = #tpu.pipeline_mode<synchronous>, transform_indices = @transform_5, window_bounds = array<i64: 128, 128>}, {pipeline_mode = #tpu.pipeline_mode<synchronous>, transform_indices = @transform_6, window_bounds = array<i64: 1, 128>}, {pipeline_mode = #tpu.pipeline_mode<synchronous>, transform_indices = @transform_7, window_bounds = array<i64: 128, 32>}, {pipeline_mode = #tpu.pipeline_mode<synchronous>, transform_indices = @transform_8, window_bounds = array<i64: 1, 32>}, {transform_indices = @transform_9, window_bounds = array<i64: 128, 64>}, {transform_indices = @transform_10, window_bounds = array<i64: 128, 32>}]} {
    %c0 = arith.constant 0 : index
    %c0_0 = arith.constant 0 : index
    %0 = vector.load %arg1[%c0, %c0_0] : memref<128x32xf32, #tpu.memory_space<vmem>>, vector<128x32xf32>
    %c0_1 = arith.constant 0 : index
    %c0_2 = arith.constant 0 : index
    %1 = vector.load %arg2[%c0_1, %c0_2] : memref<32x128xf32, #tpu.memory_space<vmem>>, vector<32x128xf32>
    %cst = arith.constant dense<0.000000e+00> : vector<128x128xf32>
    %2 = tpu.matmul %0, %1, %cst {dimension_numbers = #tpu.dot_dimension_numbers<[1], [0], [0], [1], [0, 0, 1, 1], [], []>} : vector<128x32xf32>, vector<32x128xf32>, vector<128x128xf32> -> vector<128x128xf32>
    %c0_3 = arith.constant 0 : index
    %c0_4 = arith.constant 0 : index
    %3 = vector.load %arg3[%c0_3, %c0_4] : memref<1x128xf32, #tpu.memory_space<vmem>>, vector<1x128xf32>
    %4 = vector.broadcast %3 : vector<1x128xf32> to vector<128x128xf32>
    %5 = arith.addf %2, %4 : vector<128x128xf32>
    %cst_5 = arith.constant 0.000000e+00 : f32
    %6 = vector.broadcast %cst_5 : f32 to vector<128x128xf32>
    %7 = arith.maximumf %5, %6 : vector<128x128xf32>
    %c0_6 = arith.constant 0 : index
    %c0_7 = arith.constant 0 : index
    %8 = vector.load %arg4[%c0_6, %c0_7] : memref<128x64xf32, #tpu.memory_space<vmem>>, vector<128x64xf32>
    %cst_8 = arith.constant dense<0.000000e+00> : vector<128x64xf32>
    %9 = tpu.matmul %7, %8, %cst_8 {dimension_numbers = #tpu.dot_dimension_numbers<[1], [0], [0], [1], [0, 0, 1, 1], [], []>} : vector<128x128xf32>, vector<128x64xf32>, vector<128x64xf32> -> vector<128x64xf32>
    %c0_9 = arith.constant 0 : index
    %c0_10 = arith.constant 0 : index
    %10 = vector.load %arg5[%c0_9, %c0_10] : memref<1x64xf32, #tpu.memory_space<vmem>>, vector<1x64xf32>
    %11 = vector.broadcast %10 : vector<1x64xf32> to vector<128x64xf32>
    %12 = arith.addf %9, %11 : vector<128x64xf32>
    %c0_11 = arith.constant 0 : index
    %c0_12 = arith.constant 0 : index
    %13 = vector.load %arg6[%c0_11, %c0_12] : memref<128x128xf32, #tpu.memory_space<vmem>>, vector<128x128xf32>
    %cst_13 = arith.constant dense<0.000000e+00> : vector<128x128xf32>
    %14 = tpu.matmul %7, %13, %cst_13 {dimension_numbers = #tpu.dot_dimension_numbers<[1], [0], [0], [1], [0, 0, 1, 1], [], []>} : vector<128x128xf32>, vector<128x128xf32>, vector<128x128xf32> -> vector<128x128xf32>
    %c0_14 = arith.constant 0 : index
    %c0_15 = arith.constant 0 : index
    %15 = vector.load %arg7[%c0_14, %c0_15] : memref<1x128xf32, #tpu.memory_space<vmem>>, vector<1x128xf32>
    %16 = vector.broadcast %15 : vector<1x128xf32> to vector<128x128xf32>
    %17 = arith.addf %14, %16 : vector<128x128xf32>
    %cst_16 = arith.constant 0.000000e+00 : f32
    %18 = vector.broadcast %cst_16 : f32 to vector<128x128xf32>
    %19 = arith.maximumf %17, %18 : vector<128x128xf32>
    %c0_17 = arith.constant 0 : index
    %c0_18 = arith.constant 0 : index
    %20 = vector.load %arg8[%c0_17, %c0_18] : memref<128x32xf32, #tpu.memory_space<vmem>>, vector<128x32xf32>
    %cst_19 = arith.constant dense<0.000000e+00> : vector<128x32xf32>
    %21 = tpu.matmul %19, %20, %cst_19 {dimension_numbers = #tpu.dot_dimension_numbers<[1], [0], [0], [1], [0, 0, 1, 1], [], []>} : vector<128x128xf32>, vector<128x32xf32>, vector<128x32xf32> -> vector<128x32xf32>
    %c0_20 = arith.constant 0 : index
    %c0_21 = arith.constant 0 : index
    %22 = vector.load %arg9[%c0_20, %c0_21] : memref<1x32xf32, #tpu.memory_space<vmem>>, vector<1x32xf32>
    %23 = vector.broadcast %22 : vector<1x32xf32> to vector<128x32xf32>
    %24 = arith.addf %21, %23 : vector<128x32xf32>
    %cst_22 = arith.constant 5.000000e-01 : f32
    %25 = vector.broadcast %cst_22 : f32 to vector<128x32xf32>
    %26 = arith.mulf %25, %24 : vector<128x32xf32>
    %27 = math.tanh %26 : vector<128x32xf32>
    %cst_23 = arith.constant 1.000000e+00 : f32
    %28 = vector.broadcast %cst_23 : f32 to vector<128x32xf32>
    %29 = arith.addf %27, %28 : vector<128x32xf32>
    %cst_24 = arith.constant 5.000000e-01 : f32
    %30 = vector.broadcast %cst_24 : f32 to vector<128x32xf32>
    %31 = arith.mulf %30, %29 : vector<128x32xf32>
    %c0_25 = arith.constant 0 : index
    %c0_26 = arith.constant 0 : index
    %32 = vector.load %arg10[%c0_25, %c0_26] : memref<128x64xf32, #tpu.memory_space<vmem>>, vector<128x64xf32>
    tpu.vector_store %arg10[%c0_25, %c0_26], %12 {strides = array<i32>} : memref<128x64xf32, #tpu.memory_space<vmem>>, vector<128x64xf32>,
    %c0_27 = arith.constant 0 : index
    %c0_28 = arith.constant 0 : index
    %33 = vector.load %arg11[%c0_27, %c0_28] : memref<128x32xf32, #tpu.memory_space<vmem>>, vector<128x32xf32>
    tpu.vector_store %arg11[%c0_27, %c0_28], %31 {strides = array<i32>} : memref<128x32xf32, #tpu.memory_space<vmem>>, vector<128x32xf32>,
    return
  }
  func.func @transform_0(%arg0: i32) -> (i32, i32) {
    %c0_i32 = arith.constant 0 : i32
    %c0_i32_0 = arith.constant 0 : i32
    return %arg0, %c0_i32 : i32, i32
  }
  func.func @transform_1(%arg0: i32) -> (i32, i32) {
    %c0_i32 = arith.constant 0 : i32
    %c0_i32_0 = arith.constant 0 : i32
    %c0_i32_1 = arith.constant 0 : i32
    return %c0_i32, %c0_i32_0 : i32, i32
  }
  func.func @transform_2(%arg0: i32) -> (i32, i32) {
    %c0_i32 = arith.constant 0 : i32
    %c0_i32_0 = arith.constant 0 : i32
    %c0_i32_1 = arith.constant 0 : i32
    return %c0_i32, %c0_i32_0 : i32, i32
  }
  func.func @transform_3(%arg0: i32) -> (i32, i32) {
    %c0_i32 = arith.constant 0 : i32
    %c0_i32_0 = arith.constant 0 : i32
    %c0_i32_1 = arith.constant 0 : i32
    return %c0_i32, %c0_i32_0 : i32, i32
  }
  func.func @transform_4(%arg0: i32) -> (i32, i32) {
    %c0_i32 = arith.constant 0 : i32
    %c0_i32_0 = arith.constant 0 : i32
    %c0_i32_1 = arith.constant 0 : i32
    return %c0_i32, %c0_i32_0 : i32, i32
  }
  func.func @transform_5(%arg0: i32) -> (i32, i32) {
    %c0_i32 = arith.constant 0 : i32
    %c0_i32_0 = arith.constant 0 : i32
    %c0_i32_1 = arith.constant 0 : i32
    return %c0_i32, %c0_i32_0 : i32, i32
  }
  func.func @transform_6(%arg0: i32) -> (i32, i32) {
    %c0_i32 = arith.constant 0 : i32
    %c0_i32_0 = arith.constant 0 : i32
    %c0_i32_1 = arith.constant 0 : i32
    return %c0_i32, %c0_i32_0 : i32, i32
  }
  func.func @transform_7(%arg0: i32) -> (i32, i32) {
    %c0_i32 = arith.constant 0 : i32
    %c0_i32_0 = arith.constant 0 : i32
    %c0_i32_1 = arith.constant 0 : i32
    return %c0_i32, %c0_i32_0 : i32, i32
  }
  func.func @transform_8(%arg0: i32) -> (i32, i32) {
    %c0_i32 = arith.constant 0 : i32
    %c0_i32_0 = arith.constant 0 : i32
    %c0_i32_1 = arith.constant 0 : i32
    return %c0_i32, %c0_i32_0 : i32, i32
  }
  func.func @transform_9(%arg0: i32) -> (i32, i32) {
    %c0_i32 = arith.constant 0 : i32
    %c0_i32_0 = arith.constant 0 : i32
    return %arg0, %c0_i32 : i32, i32
  }
  func.func @transform_10(%arg0: i32) -> (i32, i32) {
    %c0_i32 = arith.constant 0 : i32
    %c0_i32_0 = arith.constant 0 : i32
    return %arg0, %c0_i32 : i32, i32
  }
}

</mosaic_0001>

<bundles_post_ra>
// kernel: tpu_custom_call.1
= control target key start
LH: loop header
LB: loop body
LE: loop exit
PB: predicated region body
PF: predicated region fallthrough
CT: control target
= control target key end

     0   :  { %6 = vsyncpa [#allocation3], 0  ;;  %s124_s0 = inlined_call_operand.hbm [shape: f32[8,128], index: 0, kind: input, shape index: {}]   ;;  %s125_s1 = inlined_call_operand.hbm [shape: f32[8,128], index: 1, kind: output, shape index: {}]  }
   0x1   :  { %7 = vsyncpa [#allocation4], 0  ;;  %s88_s6 = smov [#allocation2]   ;;  %s40_s10 = scalar_lea.hbm %s124_s0, 128 }
   0x2   :  { %s14_s7 = sshll.u32 %s88_s6, 4  ;;  %p41_p0 = scmp.ne.s32.totalorder %s124_s0, %s40_s10  ;;  %s15_s7 = int_to_ptr.vmem [resolvable:$true] %s14_s7 }
   0x3   :  { %p44_p1 = scmp.lt.u32.totalorder %s40_s10, %s124_s0 }
   0x5   :  { %p46_p2 = pnand %p44_p1, %p41_p0 }
   0x7   :  { %49 = shalt.err (!%p46_p2)
}
   0x8   :  { %s50_s15 = scalar_lea.vmem %s15_s7, 128  ;;  %p55_p4 = scmp.lt.s32.totalorder %s15_s7, %s15_s7 }
   0x9   :  { %p51_p3 = scmp.ne.s32.totalorder %s15_s7, %s50_s15  ;;  %p56_p5 = scmp.lt.s32.totalorder %s50_s15, %s50_s15 }
   0xb   :  { %p57_p6 = por %p56_p5, %p55_p4 }
   0xd   :  { %p58_p7 = pnand %p57_p6, %p51_p3 }
   0xf   :  { %61 = shalt.err (!%p58_p7)
}
  0x10   :  { %17 = dma.hbm_to_vmem [thread:$0]  %s124_s0, 128, %s15_s7, [#allocation3]  }
  0x11   :  { %84 = dma.done.wait [#allocation3], 128  }
  0x12   :  { %85 = vsyncadd [#allocation3], 4294967168  ;;  %s89_s18 = smov [#allocation5]   ;;  %v21_v0 = vld [vmem:[#allocation2] sm:$0xff] }
  0x13   :  { %s29_s19 = sshll.u32 %s89_s18, 4  ;;  %22 = vst [vmem:[#allocation5] sm:$0xff] %v21_v0  ;;  %s30_s19 = int_to_ptr.vmem [resolvable:$true] %s29_s19 }
  0x14   :  { %s62_s20 = scalar_lea.vmem %s30_s19, 128  ;;  %p67_p9 = scmp.lt.s32.totalorder %s30_s19, %s30_s19 }
  0x15   :  { %p63_p8 = scmp.ne.s32.totalorder %s30_s19, %s62_s20  ;;  %p68_p10 = scmp.lt.s32.totalorder %s62_s20, %s62_s20 }
  0x17   :  { %p69_p11 = por %p68_p10, %p67_p9 }
  0x19   :  { %p70_p12 = pnand %p69_p11, %p63_p8 }
  0x1b   :  { %73 = shalt.err (!%p70_p12)
}
  0x1c   :  { %s74_s23 = scalar_lea.hbm %s125_s1, 128 }
  0x1d   :  { %p75_p13 = scmp.ne.s32.totalorder %s125_s1, %s74_s23  ;;  %p78_p0 = scmp.lt.u32.totalorder %s74_s23, %s125_s1 }
  0x1f   :  { %p80_p1 = pnand %p78_p0, %p75_p13 }
  0x21   :  { %83 = shalt.err (!%p80_p1)
}
  0x22   :  { %32 = dma.vmem_to_hbm [thread:$0]  %s30_s19, 128, %s125_s1, [#allocation4]  }
  0x23   :  { %86 = dma.done.wait [#allocation4], 128  }
  0x24   :  { %87 = vsyncadd [#allocation4], 4294967168 }
  0x25   :  { %36 = vsyncpa [#allocation3], 1 }
  0x26   :  { %37 = vsyncpa [#allocation4], 1 }

// kernel: _forward_impl.1
= control target key start
LH: loop header
LB: loop body
LE: loop exit
PB: predicated region body
PF: predicated region fallthrough
CT: control target
= control target key end

     0   :  { %s1893_s13 = smov 0   ;;  %s2260_s0 = inlined_call_operand.vmem [shape: f32[512,32], index: 0, kind: input, shape index: {}]   ;;  %s2261_s1 = inlined_call_operand.vmem [shape: f32[32,128], index: 1, kind: input, shape index: {}]   ;;  %s2262_s2 = inlined_call_operand.vmem [shape: f32[1,128], index: 2, kind: input, shape index: {}]   ;;  %s2263_s3 = inlined_call_operand.vmem [shape: f32[128,64], index: 3, kind: input, shape index: {}]   ;;  %s2264_s4 = inlined_call_operand.vmem [shape: f32[1,64], index: 4, kind: input, shape index: {}]   ;;  %s2265_s5 = inlined_call_operand.vmem [shape: f32[128,128], index: 5, kind: input, shape index: {}]   ;;  %s2266_s6 = inlined_call_operand.vmem [shape: f32[1,128], index: 6, kind: input, shape index: {}]   ;;  %s2267_s7 = inlined_call_operand.vmem [shape: f32[128,32], index: 7, kind: input, shape index: {}]   ;;  %s2268_s8 = inlined_call_operand.vmem [shape: f32[1,32], index: 8, kind: input, shape index: {}]   ;;  %s2269_s9 = inlined_call_operand.vmem [shape: f32[512,64], index: 9, kind: output, shape index: {0}]   ;;  %s2270_s10 = inlined_call_operand.vmem [shape: f32[512,32], index: 10, kind: output, shape index: {1}]  }
   0x1 LB: > { %s1321_s14 = sadd.s32 4294967295, %s1836_s13   ;;  %p1325_p0 = scmp.ge.s32.totalorder %s1836_s13, 1  ;;  %s1836_s13 = sphi %s1893_s13, %s21_s13  }
   0x2   : > { %p316_p1 = scmp.lt.s32.totalorder %s1836_s13, 5 }
   0x4   : > { %p317_p2 = pnand %p1325_p0, %p316_p1 }
   0x5   : > { %v393_v0 = vld [vmem:[%s2261_s1] sm:$0xff] (!%p317_p2)  ;;  %v394_v1 = vld [vmem:[%s2261_s1 + $0x8] sm:$0xff] (!%p317_p2)  ;;  %v395_v2 = vld [vmem:[%s2261_s1 + $0x10] sm:$0xff] (!%p317_p2)  ;;  %s1326_s21 = sshll.u32 (!%p317_p2), %s1321_s14, 4  ;;  %vm404_vm0 = vcmask (!%p317_p2), 261120   ;;  %vm1198_vm1 = vcmask (!%p317_p2), 523264  }
   0x6   : > { %320 = sbr.rel (%p317_p2) target bundleno = 715 (0x2cb), region = 56  ;;  %v1670_v3 = vpack.c.bf16 (!%p317_p2), %v394_v1, %v393_v0  ;;  %v396_v4 = vld [vmem:[%s2261_s1 + $0x18] sm:$0xff] (!%p317_p2)  ;;  %p360_p3 = scmp.lt.s32.totalorder (!%p317_p2), %s1326_s21, 63  ;;  %v782_v5 = vld [vmem:[%s2265_s5] sm:$0xff] (!%p317_p2)  ;;  %v783_v7 = vld [vmem:[%s2265_s5 + $0x8] sm:$0xff] (!%p317_p2) }
   0x7   : > { %v1674_v6 = vpack.c.bf16 (!%p317_p2), %v396_v4, %v395_v2  ;;  %v614_v8 = vld [vmem:[%s2263_s3] sm:$0xff] (!%p317_p2)  ;;  %v615_v9 = vld [vmem:[%s2263_s3 + $0x8] sm:$0xff] (!%p317_p2)  ;;  %v616_v11 = vld [vmem:[%s2263_s3 + $0x10] sm:$0xff] (!%p317_p2)  ;;  %v1710_v15 = vpack.c.bf16 (!%p317_p2), %v783_v7, %v782_v5 }
   0x8   : > { %1671 = vmatprep.subr.bf16.mxu0 (!%p317_p2), %v1670_v3  ;;  %v1678_v10 = vpack.c.bf16 (!%p317_p2), %v615_v9, %v614_v8  ;;  %v617_v12 = vld [vmem:[%s2263_s3 + $0x18] sm:$0xff] (!%p317_p2)  ;;  %v618_v14 = vld [vmem:[%s2263_s3 + $0x20] sm:$0xff] (!%p317_p2)  ;;  %v619_v16 = vld [vmem:[%s2263_s3 + $0x28] sm:$0xff] (!%p317_p2) }
   0x9   : > { %1673 = vmatpush3.bf16.msra.mxu0 (!%p317_p2), %v1670_v3  ;;  %v1682_v13 = vpack.c.bf16 (!%p317_p2), %v617_v12, %v616_v11  ;;  %v784_v17 = vld [vmem:[%s2265_s5 + $0x10] sm:$0xff] (!%p317_p2)  ;;  %v785_v18 = vld [vmem:[%s2265_s5 + $0x18] sm:$0xff] (!%p317_p2)  ;;  %v1686_v20 = vpack.c.bf16 (!%p317_p2), %v619_v16, %v618_v14  ;;  %v786_v26 = vld [vmem:[%s2265_s5 + $0x20] sm:$0xff] (!%p317_p2) }
   0xa   : > { %1675 = vmatprep.subr.bf16.mxu0 (!%p317_p2), %v1674_v6  ;;  %1679 = vmatprep.subr.bf16.mxu1 (!%p317_p2), %v1678_v10  ;;  %v620_v22 = vld [vmem:[%s2263_s3 + $0x30] sm:$0xff] (!%p317_p2)  ;;  %v621_v23 = vld [vmem:[%s2263_s3 + $0x38] sm:$0xff] (!%p317_p2)  ;;  %v1714_v25 = vpack.c.bf16 (!%p317_p2), %v785_v18, %v784_v17  ;;  %v787_v27 = vld [vmem:[%s2265_s5 + $0x28] sm:$0xff] (!%p317_p2) }
   0xb   : > { %1681 = vmatpush3.bf16.msra.mxu1 (!%p317_p2), %v1678_v10  ;;  %v1690_v28 = vpack.c.bf16 (!%p317_p2), %v621_v23, %v620_v22  ;;  %v622_v30 = vld [vmem:[%s2263_s3 + $0x40] sm:$0xff] (!%p317_p2)  ;;  %v1718_v32 = vpack.c.bf16 (!%p317_p2), %v787_v27, %v786_v26  ;;  %v623_v33 = vld [vmem:[%s2263_s3 + $0x48] sm:$0xff] (!%p317_p2)  ;;  %v788_v34 = vld [vmem:[%s2265_s5 + $0x30] sm:$0xff] (!%p317_p2) }
   0xc   : > { %1683 = vmatprep.subr.bf16.mxu1 (!%p317_p2), %v1682_v13  ;;  %v789_v35 = vld [vmem:[%s2265_s5 + $0x38] sm:$0xff] (!%p317_p2)  ;;  %v1694_v36 = vpack.c.bf16 (!%p317_p2), %v623_v33, %v622_v30  ;;  %v624_v38 = vld [vmem:[%s2263_s3 + $0x50] sm:$0xff] (!%p317_p2)  ;;  %v790_v42 = vld [vmem:[%s2265_s5 + $0x40] sm:$0xff] (!%p317_p2) }
   0xd   : > { %s2272_s21 = smov (!%p360_p3, %s1326_s21), 63  ;;  %1677 = vmatpush3.bf16.msra.mxu0 %v1674_v6  ;;  %v625_v39 = vld [vmem:[%s2263_s3 + $0x58] sm:$0xff]  ;;  %v1722_v41 = vpack.c.bf16 %v789_v35, %v788_v34  ;;  %v791_v43 = vld [vmem:[%s2265_s5 + $0x48] sm:$0xff]  ;;  %v626_v46 = vld [vmem:[%s2263_s3 + $0x60] sm:$0xff] }
   0xe   : > { %s1934_s19 = sshll.u32 %s2272_s21, 3  ;;  %1711 = vmatprep.subr.bf16.mxu0 %v1710_v15  ;;  %v1698_v44 = vpack.c.bf16 %v625_v39, %v624_v38  ;;  %v627_v47 = vld [vmem:[%s2263_s3 + $0x68] sm:$0xff]  ;;  %v1726_v49 = vpack.c.bf16 %v791_v43, %v790_v42  ;;  %v792_v50 = vld [vmem:[%s2265_s5 + $0x50] sm:$0xff]  ;;  %v793_v51 = vld [vmem:[%s2265_s5 + $0x58] sm:$0xff] }
   0xf   : > { %s1943_s25 = scalar_lea.vmem %s2260_s0, %s1934_s19  ;;  %1685 = vmatpush3.bf16.msra.mxu1 %v1682_v13  ;;  %v1702_v52 = vpack.c.bf16 %v627_v47, %v626_v46  ;;  %v1730_v55 = vpack.c.bf16 %v793_v51, %v792_v50  ;;  %v794_v56 = vld [vmem:[%s2265_s5 + $0x60] sm:$0xff]  ;;  %v795_v57 = vld [vmem:[%s2265_s5 + $0x68] sm:$0xff]  ;;  %v796_v0 = vld [vmem:[%s2265_s5 + $0x70] sm:$0xff]  ;;  %s2132_s26 = scalar_lea.vmem %s2269_s9, %s1934_s19 }
  0x10   : > { %v377_v19 = vld [vmem:[%s1943_s25] sm:$0xff]  ;;  %v378_v21 = vld [vmem:[%s1943_s25 + $0x8] sm:$0xff]  ;;  %v379_v24 = vld [vmem:[%s1943_s25 + $0x10] sm:$0xff]  ;;  %1687 = vmatprep.subr.bf16.mxu1 %v1686_v20  ;;  %v1734_v60 = vpack.c.bf16 %v795_v57, %v794_v56  ;;  %s2215_s30 = scalar_lea.vmem %s2270_s10, %s1934_s19 }
  0x11   : > { %1478 = vmatprep.mubr.msk.f32.mxu0 %vm404_vm0, %v377_v19  ;;  %v380_v29 = vld [vmem:[%s1943_s25 + $0x18] sm:$0xff]  ;;  %v381_v31 = vld [vmem:[%s1943_s25 + $0x20] sm:$0xff]  ;;  %v382_v37 = vld [vmem:[%s1943_s25 + $0x28] sm:$0xff] }
  0x12   : > { %1479 = vmatmul.mubr.msk.f32.vlgmr.msra.gmra.mrb[0].mxu0 %vm404_vm0, %v378_v21  ;;  %v383_v40 = vld [vmem:[%s1943_s25 + $0x30] sm:$0xff]  ;;  %v384_v45 = vld [vmem:[%s1943_s25 + $0x38] sm:$0xff]  ;;  %v385_v48 = vld [vmem:[%s1943_s25 + $0x40] sm:$0xff] }
  0x13   : > { %1481 = vmatprep.mubr.msk.f32.mxu0 %vm404_vm0, %v379_v24  ;;  %1713 = vmatpush3.bf16.msra.mxu0 %v1710_v15  ;;  %v386_v53 = vld [vmem:[%s1943_s25 + $0x48] sm:$0xff]  ;;  %v387_v54 = vld [vmem:[%s1943_s25 + $0x50] sm:$0xff]  ;;  %v388_v58 = vld [vmem:[%s1943_s25 + $0x58] sm:$0xff] }
  0x14   : > { %1715 = vmatprep.subr.bf16.mxu0 %v1714_v25  ;;  %1689 = vmatpush3.bf16.msra.mxu1 %v1686_v20  ;;  %v389_v59 = vld [vmem:[%s1943_s25 + $0x60] sm:$0xff]  ;;  %v390_v61 = vld [vmem:[%s1943_s25 + $0x68] sm:$0xff]  ;;  %v391_v62 = vld [vmem:[%s1943_s25 + $0x70] sm:$0xff] }
  0x15   : > { %1691 = vmatprep.subr.bf16.mxu1 %v1690_v28  ;;  %v392_v63 = vld [vmem:[%s1943_s25 + $0x78] sm:$0xff]  ;;  %v628_v3 = vld [vmem:[%s2263_s3 + $0x70] sm:$0xff]  ;;  %v966_v6 = vld [vmem:[%s2267_s7] sm:$0xff] }
  0x16   : > { %1482 = vmatmul.mubr.msk.f32.gmra.mrb[2].mxu0 %vm404_vm0, %v380_v29  ;;  %v797_v1 = vld [vmem:[%s2265_s5 + $0x78] sm:$0xff]  ;;  %v967_v7 = vld [vmem:[%s2267_s7 + $0x8] sm:$0xff]  ;;  %v2058_v9 = vld [vmem:[%s2262_s2] ss:$0 sm:$0xff] }
  0x17   : > { %1484 = vmatprep.mubr.msk.f32.mxu0 %vm404_vm0, %v381_v31  ;;  %1717 = vmatpush3.bf16.msra.mxu0 %v1714_v25  ;;  %v1738_v2 = vpack.c.bf16 %v797_v1, %v796_v0  ;;  %v629_v4 = vld [vmem:[%s2263_s3 + $0x78] sm:$0xff]  ;;  %v1742_v8 = vpack.c.bf16 %v967_v7, %v966_v6  ;;  %v968_v14 = vld [vmem:[%s2267_s7 + $0x10] sm:$0xff]  ;;  %v970_v23 = vld [vmem:[%s2267_s7 + $0x20] sm:$0xff] }
  0x18   : > { %1719 = vmatprep.subr.bf16.mxu0 %v1718_v32  ;;  %1693 = vmatpush3.bf16.msra.mxu1 %v1690_v28  ;;  %v1706_v5 = vpack.c.bf16 %v629_v4, %v628_v3  ;;  %v969_v15 = vld [vmem:[%s2267_s7 + $0x18] sm:$0xff]  ;;  %v971_v24 = vld [vmem:[%s2267_s7 + $0x28] sm:$0xff]  ;;  %v976_v50 = vld [vmem:[%s2267_s7 + $0x50] sm:$0xff] }
  0x19   : > { %1695 = vmatprep.subr.bf16.mxu1 %v1694_v36  ;;  %v1746_v21 = vpack.c.bf16 %v969_v15, %v968_v14  ;;  %v1750_v30 = vpack.c.bf16 %v971_v24, %v970_v23  ;;  %v973_v33 = vld [vmem:[%s2267_s7 + $0x38] sm:$0xff]  ;;  %v975_v42 = vld [vmem:[%s2267_s7 + $0x48] sm:$0xff]  ;;  %v2121_v15 = vld [vmem:[%s2264_s4] ss:$0 sm:$0xff] }
  0x1a   : > { %1485 = vmatmul.mubr.msk.f32.gmra.mrb[4].mxu0 %vm404_vm0, %v382_v37  ;;  %v977_v51 = vld [vmem:[%s2267_s7 + $0x58] sm:$0xff] }
  0x1b   : > { %1487 = vmatprep.mubr.msk.f32.mxu0 %vm404_vm0, %v383_v40  ;;  %1721 = vmatpush3.bf16.msra.mxu0 %v1718_v32  ;;  %v972_v32 = vld [vmem:[%s2267_s7 + $0x30] sm:$0xff]  ;;  %v1762_v57 = vpack.c.bf16 %v977_v51, %v976_v50 }
  0x1c   : > { %1723 = vmatprep.subr.bf16.mxu0 %v1722_v41  ;;  %1697 = vmatpush3.bf16.msra.mxu1 %v1694_v36  ;;  %v1754_v39 = vpack.c.bf16 %v973_v33, %v972_v32 }
  0x1d   : > { %1699 = vmatprep.subr.bf16.mxu1 %v1698_v44 }
  0x1e   : > { %1488 = vmatmul.mubr.msk.f32.gmra.mrb[6].mxu0 %vm404_vm0, %v384_v45 }
  0x1f   : > { %1490 = vmatprep.mubr.msk.f32.mxu0 %vm404_vm0, %v385_v48  ;;  %1725 = vmatpush3.bf16.msra.mxu0 %v1722_v41  ;;  %v974_v41 = vld [vmem:[%s2267_s7 + $0x40] sm:$0xff] }
  0x20   : > { %1727 = vmatprep.subr.bf16.mxu0 %v1726_v49  ;;  %1701 = vmatpush3.bf16.msra.mxu1 %v1698_v44  ;;  %v1758_v48 = vpack.c.bf16 %v975_v42, %v974_v41 }
  0x21   : > { %1703 = vmatprep.subr.bf16.mxu1 %v1702_v52 }
  0x22   : > { %1491 = vmatmul.mubr.msk.f32.gmra.mrb[8].mxu0 %vm404_vm0, %v386_v53 }
  0x23   : > { %1493 = vmatprep.mubr.msk.f32.mxu0 %vm404_vm0, %v387_v54  ;;  %1729 = vmatpush3.bf16.msra.mxu0 %v1726_v49 }
  0x24   : > { %1731 = vmatprep.subr.bf16.mxu0 %v1730_v55  ;;  %1705 = vmatpush3.bf16.msra.mxu1 %v1702_v52 }
  0x25   : > { %1707 = vmatprep.subr.bf16.mxu1 %v1706_v5 }
  0x26   : > { %1494 = vmatmul.mubr.msk.f32.gmra.mrb[10].mxu0 %vm404_vm0, %v388_v58 }
  0x27   : > { %1496 = vmatprep.mubr.msk.f32.mxu0 %vm404_vm0, %v389_v59  ;;  %1733 = vmatpush3.bf16.msra.mxu0 %v1730_v55  ;;  %v978_v59 = vld [vmem:[%s2267_s7 + $0x60] sm:$0xff] }
  0x28   : > { %1735 = vmatprep.subr.bf16.mxu0 %v1734_v60  ;;  %1709 = vmatpush3.bf16.msra.mxu1 %v1706_v5 }
  0x29   : > { %1774 = vmatprep.subr.bf16.mxu1 %v1742_v8 }
  0x2a   : > { %1497 = vmatmul.mubr.msk.f32.gmra.mrb[12].mxu0 %vm404_vm0, %v390_v61 }
  0x2b   : > { %1499 = vmatprep.mubr.msk.f32.mxu0 %vm404_vm0, %v391_v62  ;;  %1737 = vmatpush3.bf16.msra.mxu0 %v1734_v60  ;;  %v979_v60 = vld [vmem:[%s2267_s7 + $0x68] sm:$0xff] }
  0x2c   : > { %1739 = vmatprep.subr.bf16.mxu0 %v1738_v2 }
  0x2e   : > { %1500 = vmatmul.mubr.msk.f32.gmra.mrb[14].mxu0 %vm404_vm0, %v392_v63 }
  0x2f   : > { %1741 = vmatpush3.bf16.msra.mxu0 %v1738_v2  ;;  %v1766_v2 = vpack.c.bf16 %v979_v60, %v978_v59 }
  0x30   : > { %1743 = vmatprep.subr.bf16.mxu0 %v1742_v8 }
  0xe5   : > { %v1480_v10 = vpop.f32.mrb[0].mxu0 }
  0xe6   : > { %v525_v11 = vadd.f32 %v1480_v10, %v2058_v9  ;;  %v519_v12 = vpop.f32.mrb[1].mxu0 }
  0xe7   : > { %v520_v13 = vadd.f32 %v2058_v9, %v519_v12 }
  0xe8   : > { %v599_v18 = vmax.f32 %v525_v11, 0.0 }
  0xe9   : > { %v598_v16 = vmax.f32 %v520_v13, 0.0  ;;  %v1483_v17 = vpop.f32.mrb[2].mxu0  ;;  %v980_v13 = vld [vmem:[%s2267_s7 + $0x70] sm:$0xff] }
  0xea   : > { %v535_v19 = vadd.f32 %v1483_v17, %v2058_v9  ;;  %v529_v20 = vpop.f32.mrb[3].mxu0 }
  0xeb   : > { %v530_v22 = vadd.f32 %v2058_v9, %v529_v20  ;;  %1534 = vmatprep.mubr.f32.mxu1 %v598_v16  ;;  %1590 = vmatprep.mubr.f32.mxu0 %v598_v16  ;;  %v2126_v16 = vld [vmem:[%s2266_s6] ss:$0 sm:$0xff] }
  0xec   : > { %1535 = vmatmul.mubr.f32.vlgmr.msra.gmra.mrb[0].mxu1 %v599_v18  ;;  %1591 = vmatmul.mubr.f32.vlgmr.msra.gmra.mrb[16].mxu0 %v599_v18  ;;  %v601_v27 = vmax.f32 %v535_v19, 0.0 }
  0xed   : > { %v600_v25 = vmax.f32 %v530_v22, 0.0  ;;  %v1486_v26 = vpop.f32.mrb[4].mxu0  ;;  %1745 = vmatpush3.bf16.msra.mxu0 %v1742_v8  ;;  %1782 = vmatpush3.bf16.msra.mxu1 %v1742_v8 }
  0xee   : > { %v545_v28 = vadd.f32 %v1486_v26, %v2058_v9  ;;  %v539_v29 = vpop.f32.mrb[5].mxu0  ;;  %1747 = vmatprep.subr.bf16.mxu0 %v1746_v21  ;;  %1775 = vmatprep.subr.bf16.mxu1 %v1746_v21 }
  0xef   : > { %v540_v31 = vadd.f32 %v2058_v9, %v539_v29  ;;  %1537 = vmatprep.mubr.f32.mxu1 %v600_v25  ;;  %1593 = vmatprep.mubr.f32.mxu0 %v600_v25 }
  0xf0   : > { %1538 = vmatmul.mubr.f32.gmra.mrb[2].mxu1 %v601_v27  ;;  %1594 = vmatmul.mubr.f32.gmra.mrb[18].mxu0 %v601_v27  ;;  %v603_v36 = vmax.f32 %v545_v28, 0.0 }
  0xf1   : > { %v602_v34 = vmax.f32 %v540_v31, 0.0  ;;  %v1489_v35 = vpop.f32.mrb[6].mxu0  ;;  %1749 = vmatpush3.bf16.msra.mxu0 %v1746_v21  ;;  %1783 = vmatpush3.bf16.msra.mxu1 %v1746_v21 }
  0xf2   : > { %v555_v37 = vadd.f32 %v1489_v35, %v2058_v9  ;;  %v549_v38 = vpop.f32.mrb[7].mxu0  ;;  %1751 = vmatprep.subr.bf16.mxu0 %v1750_v30  ;;  %1776 = vmatprep.subr.bf16.mxu1 %v1750_v30 }
  0xf3   : > { %v550_v40 = vadd.f32 %v2058_v9, %v549_v38  ;;  %1540 = vmatprep.mubr.f32.mxu1 %v602_v34  ;;  %1596 = vmatprep.mubr.f32.mxu0 %v602_v34 }
  0xf4   : > { %1541 = vmatmul.mubr.f32.gmra.mrb[4].mxu1 %v603_v36  ;;  %1597 = vmatmul.mubr.f32.gmra.mrb[20].mxu0 %v603_v36  ;;  %v605_v45 = vmax.f32 %v555_v37, 0.0 }
  0xf5   : > { %v604_v43 = vmax.f32 %v550_v40, 0.0  ;;  %v1492_v44 = vpop.f32.mrb[8].mxu0  ;;  %1753 = vmatpush3.bf16.msra.mxu0 %v1750_v30  ;;  %1784 = vmatpush3.bf16.msra.mxu1 %v1750_v30 }
  0xf6   : > { %v565_v46 = vadd.f32 %v1492_v44, %v2058_v9  ;;  %v559_v47 = vpop.f32.mrb[9].mxu0  ;;  %1755 = vmatprep.subr.bf16.mxu0 %v1754_v39  ;;  %1777 = vmatprep.subr.bf16.mxu1 %v1754_v39 }
  0xf7   : > { %v560_v49 = vadd.f32 %v2058_v9, %v559_v47  ;;  %1543 = vmatprep.mubr.f32.mxu1 %v604_v43  ;;  %1599 = vmatprep.mubr.f32.mxu0 %v604_v43 }
  0xf8   : > { %1544 = vmatmul.mubr.f32.gmra.mrb[6].mxu1 %v605_v45  ;;  %1600 = vmatmul.mubr.f32.gmra.mrb[22].mxu0 %v605_v45  ;;  %v607_v54 = vmax.f32 %v565_v46, 0.0 }
  0xf9   : > { %v606_v52 = vmax.f32 %v560_v49, 0.0  ;;  %v1495_v53 = vpop.f32.mrb[10].mxu0  ;;  %1757 = vmatpush3.bf16.msra.mxu0 %v1754_v39  ;;  %1785 = vmatpush3.bf16.msra.mxu1 %v1754_v39 }
  0xfa   : > { %v575_v55 = vadd.f32 %v1495_v53, %v2058_v9  ;;  %v569_v56 = vpop.f32.mrb[11].mxu0  ;;  %1759 = vmatprep.subr.bf16.mxu0 %v1758_v48  ;;  %1778 = vmatprep.subr.bf16.mxu1 %v1758_v48 }
  0xfb   : > { %v570_v58 = vadd.f32 %v2058_v9, %v569_v56  ;;  %1546 = vmatprep.mubr.f32.mxu1 %v606_v52  ;;  %1602 = vmatprep.mubr.f32.mxu0 %v606_v52 }
  0xfc   : > { %1547 = vmatmul.mubr.f32.gmra.mrb[8].mxu1 %v607_v54  ;;  %1603 = vmatmul.mubr.f32.gmra.mrb[24].mxu0 %v607_v54  ;;  %v609_v63 = vmax.f32 %v575_v55, 0.0 }
  0xfd   : > { %v608_v61 = vmax.f32 %v570_v58, 0.0  ;;  %v1498_v62 = vpop.f32.mrb[12].mxu0  ;;  %1761 = vmatpush3.bf16.msra.mxu0 %v1758_v48  ;;  %1786 = vmatpush3.bf16.msra.mxu1 %v1758_v48 }
  0xfe   : > { %v585_v0 = vadd.f32 %v1498_v62, %v2058_v9  ;;  %v579_v1 = vpop.f32.mrb[13].mxu0  ;;  %1763 = vmatprep.subr.bf16.mxu0 %v1762_v57  ;;  %1779 = vmatprep.subr.bf16.mxu1 %v1762_v57 }
  0xff   : > { %v580_v3 = vadd.f32 %v2058_v9, %v579_v1  ;;  %1549 = vmatprep.mubr.f32.mxu1 %v608_v61  ;;  %1605 = vmatprep.mubr.f32.mxu0 %v608_v61 }
 0x100   : > { %1550 = vmatmul.mubr.f32.gmra.mrb[10].mxu1 %v609_v63  ;;  %1606 = vmatmul.mubr.f32.gmra.mrb[26].mxu0 %v609_v63  ;;  %v611_v6 = vmax.f32 %v585_v0, 0.0 }
 0x101   : > { %v610_v4 = vmax.f32 %v580_v3, 0.0  ;;  %v1501_v5 = vpop.f32.mrb[14].mxu0  ;;  %1765 = vmatpush3.bf16.msra.mxu0 %v1762_v57  ;;  %1787 = vmatpush3.bf16.msra.mxu1 %v1762_v57 }
 0x102   : > { %v595_v7 = vadd.f32 %v1501_v5, %v2058_v9  ;;  %v589_v8 = vpop.f32.mrb[15].mxu0  ;;  %1767 = vmatprep.subr.bf16.mxu0 %v1766_v2  ;;  %1780 = vmatprep.subr.bf16.mxu1 %v1766_v2 }
 0x103   : > { %v590_v10 = vadd.f32 %v2058_v9, %v589_v8  ;;  %1552 = vmatprep.mubr.f32.mxu1 %v610_v4  ;;  %1608 = vmatprep.mubr.f32.mxu0 %v610_v4  ;;  %v981_v9 = vld [vmem:[%s2267_s7 + $0x78] sm:$0xff] }
 0x104   : > { %1553 = vmatmul.mubr.f32.gmra.mrb[12].mxu1 %v611_v6  ;;  %1609 = vmatmul.mubr.f32.gmra.mrb[28].mxu0 %v611_v6  ;;  %v613_v12 = vmax.f32 %v595_v7, 0.0  ;;  %v1770_v14 = vpack.c.bf16 %v981_v9, %v980_v13 }
 0x105   : > { %v612_v11 = vmax.f32 %v590_v10, 0.0  ;;  %1769 = vmatpush3.bf16.msra.mxu0 %v1766_v2  ;;  %1788 = vmatpush3.bf16.msra.mxu1 %v1766_v2 }
 0x106   : > { %1771 = vmatprep.subr.bf16.mxu0 %v1770_v14  ;;  %1781 = vmatprep.subr.bf16.mxu1 %v1770_v14 }
 0x107   : > { %1555 = vmatprep.mubr.f32.mxu1 %v612_v11  ;;  %1611 = vmatprep.mubr.f32.mxu0 %v612_v11 }
 0x108   : > { %1556 = vmatmul.mubr.f32.gmra.mrb[14].mxu1 %v613_v12  ;;  %1612 = vmatmul.mubr.f32.gmra.mrb[30].mxu0 %v613_v12 }
 0x109   : > { %1773 = vmatpush3.bf16.msra.mxu0 %v1770_v14  ;;  %1789 = vmatpush3.bf16.msra.mxu1 %v1770_v14 }
 0x1bf   : > { %v1536_v17 = vpop.f32.mrb[0].mxu1  ;;  %v1592_v18 = vpop.f32.mrb[16].mxu0 }
 0x1c0   : > { %v709_v19 = vadd.f32 %v1536_v17, %v2121_v15  ;;  %v877_v20 = vadd.f32 %v1592_v18, %v2126_v16  ;;  %v703_v21 = vpop.f32.mrb[1].mxu1  ;;  %v871_v22 = vpop.f32.mrb[17].mxu0 }
 0x1c1   : > { %v704_v23 = vadd.f32 %v2121_v15, %v703_v21  ;;  %v872_v24 = vadd.f32 %v2126_v16, %v871_v22 }
 0x1c2   : > { %1200 = vst.msk [vmem:[%s2132_s26 + $0x8] sm:$0xff] %vm1198_vm1, %v709_v19  ;;  %v951_v28 = vmax.f32 %v877_v20, 0.0 }
 0x1c3   : > { %1199 = vst.msk [vmem:[%s2132_s26] sm:$0xff] %vm1198_vm1, %v704_v23  ;;  %v950_v25 = vmax.f32 %v872_v24, 0.0  ;;  %v1539_v26 = vpop.f32.mrb[2].mxu1  ;;  %v1595_v27 = vpop.f32.mrb[18].mxu0 }
 0x1c4   : > { %v719_v29 = vadd.f32 %v1539_v26, %v2121_v15  ;;  %v887_v30 = vadd.f32 %v1595_v27, %v2126_v16  ;;  %v713_v31 = vpop.f32.mrb[3].mxu1  ;;  %v881_v32 = vpop.f32.mrb[19].mxu0 }
 0x1c5   : > { %v714_v33 = vadd.f32 %v2121_v15, %v713_v31  ;;  %v882_v34 = vadd.f32 %v2126_v16, %v881_v32  ;;  %1646 = vmatprep.mubr.f32.mxu0 %v950_v25 }
 0x1c6   : > { %1202 = vst.msk [vmem:[%s2132_s26 + $0x18] sm:$0xff] %vm1198_vm1, %v719_v29  ;;  %1647 = vmatmul.mubr.f32.vlgmr.msra.gmra.mrb[32].mxu0 %v951_v28  ;;  %v953_v38 = vmax.f32 %v887_v30, 0.0 }
 0x1c7   : > { %1201 = vst.msk [vmem:[%s2132_s26 + $0x10] sm:$0xff] %vm1198_vm1, %v714_v33  ;;  %v952_v35 = vmax.f32 %v882_v34, 0.0  ;;  %v1542_v36 = vpop.f32.mrb[4].mxu1  ;;  %v1598_v37 = vpop.f32.mrb[20].mxu0 }
 0x1c8   : > { %v729_v39 = vadd.f32 %v1542_v36, %v2121_v15  ;;  %v897_v40 = vadd.f32 %v1598_v37, %v2126_v16  ;;  %v723_v41 = vpop.f32.mrb[5].mxu1  ;;  %v891_v42 = vpop.f32.mrb[21].mxu0 }
 0x1c9   : > { %v724_v43 = vadd.f32 %v2121_v15, %v723_v41  ;;  %v892_v44 = vadd.f32 %v2126_v16, %v891_v42  ;;  %1649 = vmatprep.mubr.f32.mxu0 %v952_v35  ;;  %v2201_v35 = vld [vmem:[%s2268_s8] ss:$0 sm:$0xff] }
 0x1ca   : > { %1204 = vst.msk [vmem:[%s2132_s26 + $0x28] sm:$0xff] %vm1198_vm1, %v729_v39  ;;  %1650 = vmatmul.mubr.f32.gmra.mrb[34].mxu0 %v953_v38  ;;  %v955_v48 = vmax.f32 %v897_v40, 0.0 }
 0x1cb   : > { %1203 = vst.msk [vmem:[%s2132_s26 + $0x20] sm:$0xff] %vm1198_vm1, %v724_v43  ;;  %v954_v45 = vmax.f32 %v892_v44, 0.0  ;;  %v1545_v46 = vpop.f32.mrb[6].mxu1  ;;  %v1601_v47 = vpop.f32.mrb[22].mxu0 }
 0x1cc   : > { %v739_v49 = vadd.f32 %v1545_v46, %v2121_v15  ;;  %v907_v50 = vadd.f32 %v1601_v47, %v2126_v16  ;;  %v733_v51 = vpop.f32.mrb[7].mxu1  ;;  %v901_v52 = vpop.f32.mrb[23].mxu0 }
 0x1cd   : > { %v734_v53 = vadd.f32 %v2121_v15, %v733_v51  ;;  %v902_v54 = vadd.f32 %v2126_v16, %v901_v52  ;;  %1652 = vmatprep.mubr.f32.mxu0 %v954_v45 }
 0x1ce   : > { %1206 = vst.msk [vmem:[%s2132_s26 + $0x38] sm:$0xff] %vm1198_vm1, %v739_v49  ;;  %1653 = vmatmul.mubr.f32.gmra.mrb[36].mxu0 %v955_v48  ;;  %v957_v58 = vmax.f32 %v907_v50, 0.0 }
 0x1cf   : > { %1205 = vst.msk [vmem:[%s2132_s26 + $0x30] sm:$0xff] %vm1198_vm1, %v734_v53  ;;  %v956_v55 = vmax.f32 %v902_v54, 0.0  ;;  %v1548_v56 = vpop.f32.mrb[8].mxu1  ;;  %v1604_v57 = vpop.f32.mrb[24].mxu0 }
 0x1d0   : > { %v749_v59 = vadd.f32 %v1548_v56, %v2121_v15  ;;  %v917_v60 = vadd.f32 %v1604_v57, %v2126_v16  ;;  %v743_v61 = vpop.f32.mrb[9].mxu1  ;;  %v911_v62 = vpop.f32.mrb[25].mxu0 }
 0x1d1   : > { %v744_v63 = vadd.f32 %v2121_v15, %v743_v61  ;;  %v912_v0 = vadd.f32 %v2126_v16, %v911_v62  ;;  %1655 = vmatprep.mubr.f32.mxu1 %v956_v55 }
 0x1d2   : > { %1208 = vst.msk [vmem:[%s2132_s26 + $0x48] sm:$0xff] %vm1198_vm1, %v749_v59  ;;  %1656 = vmatmul.mubr.f32.vlgmr.msra.gmra.mrb[16].mxu1 %v957_v58  ;;  %v959_v4 = vmax.f32 %v917_v60, 0.0 }
 0x1d3   : > { %1207 = vst.msk [vmem:[%s2132_s26 + $0x40] sm:$0xff] %vm1198_vm1, %v744_v63  ;;  %v958_v1 = vmax.f32 %v912_v0, 0.0  ;;  %v1551_v2 = vpop.f32.mrb[10].mxu1  ;;  %v1607_v3 = vpop.f32.mrb[26].mxu0 }
 0x1d4   : > { %v759_v5 = vadd.f32 %v1551_v2, %v2121_v15  ;;  %v927_v6 = vadd.f32 %v1607_v3, %v2126_v16  ;;  %v753_v7 = vpop.f32.mrb[11].mxu1  ;;  %v921_v8 = vpop.f32.mrb[27].mxu0 }
 0x1d5   : > { %v754_v10 = vadd.f32 %v2121_v15, %v753_v7  ;;  %v922_v11 = vadd.f32 %v2126_v16, %v921_v8  ;;  %1658 = vmatprep.mubr.f32.mxu1 %v958_v1 }
 0x1d6   : > { %1210 = vst.msk [vmem:[%s2132_s26 + $0x58] sm:$0xff] %vm1198_vm1, %v759_v5  ;;  %1659 = vmatmul.mubr.f32.gmra.mrb[18].mxu1 %v959_v4  ;;  %v961_v14 = vmax.f32 %v927_v6, 0.0 }
 0x1d7   : > { %1209 = vst.msk [vmem:[%s2132_s26 + $0x50] sm:$0xff] %vm1198_vm1, %v754_v10  ;;  %v960_v12 = vmax.f32 %v922_v11, 0.0  ;;  %v1554_v13 = vpop.f32.mrb[12].mxu1  ;;  %v1610_v9 = vpop.f32.mrb[28].mxu0 }
 0x1d8   : > { %v769_v17 = vadd.f32 %v1554_v13, %v2121_v15  ;;  %v937_v18 = vadd.f32 %v1610_v9, %v2126_v16  ;;  %v763_v19 = vpop.f32.mrb[13].mxu1  ;;  %v931_v20 = vpop.f32.mrb[29].mxu0 }
 0x1d9   : > { %v764_v21 = vadd.f32 %v2121_v15, %v763_v19  ;;  %v932_v22 = vadd.f32 %v2126_v16, %v931_v20  ;;  %1661 = vmatprep.mubr.f32.mxu1 %v960_v12 }
 0x1da   : > { %1212 = vst.msk [vmem:[%s2132_s26 + $0x68] sm:$0xff] %vm1198_vm1, %v769_v17  ;;  %1662 = vmatmul.mubr.f32.gmra.mrb[20].mxu1 %v961_v14  ;;  %v963_v26 = vmax.f32 %v937_v18, 0.0 }
 0x1db   : > { %1211 = vst.msk [vmem:[%s2132_s26 + $0x60] sm:$0xff] %vm1198_vm1, %v764_v21  ;;  %v962_v23 = vmax.f32 %v932_v22, 0.0  ;;  %v1557_v24 = vpop.f32.mrb[14].mxu1  ;;  %v1613_v25 = vpop.f32.mrb[30].mxu0 }
 0x1dc   : > { %v779_v27 = vadd.f32 %v1557_v24, %v2121_v15  ;;  %v947_v28 = vadd.f32 %v1613_v25, %v2126_v16  ;;  %v773_v29 = vpop.f32.mrb[15].mxu1  ;;  %v941_v30 = vpop.f32.mrb[31].mxu0 }
 0x1dd   : > { %v774_v31 = vadd.f32 %v2121_v15, %v773_v29  ;;  %v942_v32 = vadd.f32 %v2126_v16, %v941_v30  ;;  %1664 = vmatprep.mubr.f32.mxu1 %v962_v23 }
 0x1de   : > { %1214 = vst.msk [vmem:[%s2132_s26 + $0x78] sm:$0xff] %vm1198_vm1, %v779_v27  ;;  %1665 = vmatmul.mubr.f32.gmra.mrb[22].mxu1 %v963_v26  ;;  %v965_v34 = vmax.f32 %v947_v28, 0.0 }
 0x1df   : > { %1213 = vst.msk [vmem:[%s2132_s26 + $0x70] sm:$0xff] %vm1198_vm1, %v774_v31  ;;  %v964_v33 = vmax.f32 %v942_v32, 0.0 }
 0x1e1   : > { %1667 = vmatprep.mubr.f32.mxu1 %v964_v33 }
 0x1e2   : > { %1668 = vmatmul.mubr.f32.gmra.mrb[24].mxu1 %v965_v34 }
 0x299   : > { %v1648_v36 = vpop.f32.mrb[32].mxu0 }
 0x29a   : > { %v1061_v15 = vadd.f32 %v1648_v36, %v2201_v35  ;;  %v1055_v37 = vpop.f32.mrb[33].mxu0 }
 0x29b   : > { %v1056_v16 = vadd.f32 %v2201_v35, %v1055_v37 }
 0x29c   : > { %v1135_v38 = vmul.f32 0.5, %v1061_v15 }
 0x29d   : > { %v1134_v39 = vmul.f32 0.5, %v1056_v16  ;;  %v1651_v40 = vpop.f32.mrb[34].mxu0 }
 0x29e   : > { %1798 = vtanh.f32 %v1135_v38  ;;  %v1071_v41 = vadd.f32 %v1651_v40, %v2201_v35  ;;  %v1065_v42 = vpop.f32.mrb[35].mxu0 }
 0x29f   : > { %1800 = vtanh.f32 %v1134_v39  ;;  %v1066_v43 = vadd.f32 %v2201_v35, %v1065_v42 }
 0x2a0   : > { %v1137_v44 = vmul.f32 0.5, %v1071_v41 }
 0x2a1   : > { %v1136_v45 = vmul.f32 0.5, %v1066_v43  ;;  %v1654_v46 = vpop.f32.mrb[36].mxu0 }
 0x2a2   : > { %1802 = vtanh.f32 %v1137_v44  ;;  %v1081_v47 = vadd.f32 %v1654_v46, %v2201_v35  ;;  %v1075_v48 = vpop.f32.mrb[37].mxu0 }
 0x2a3   : > { %1804 = vtanh.f32 %v1136_v45  ;;  %v1076_v49 = vadd.f32 %v2201_v35, %v1075_v48 }
 0x2a4   : > { %v1139_v50 = vmul.f32 0.5, %v1081_v47 }
 0x2a5   : > { %v1138_v51 = vmul.f32 0.5, %v1076_v49  ;;  %v1657_v52 = vpop.f32.mrb[16].mxu1 }
 0x2a6   : > { %1806 = vtanh.f32 %v1139_v50  ;;  %v1091_v53 = vadd.f32 %v1657_v52, %v2201_v35  ;;  %v1085_v54 = vpop.f32.mrb[17].mxu1 }
 0x2a7   : > { %1808 = vtanh.f32 %v1138_v51  ;;  %v1086_v55 = vadd.f32 %v2201_v35, %v1085_v54 }
 0x2a8   : > { %v1799_v56 = vpop.eup %1798  ;;  %v1141_v57 = vmul.f32 0.5, %v1091_v53 }
 0x2a9   : > { %v1801_v58 = vpop.eup %1800  ;;  %v1167_v59 = vadd.f32 1.0, %v1799_v56  ;;  %v1140_v60 = vmul.f32 0.5, %v1086_v55  ;;  %v1660_v61 = vpop.f32.mrb[18].mxu1 }
 0x2aa   : > { %v1166_v62 = vadd.f32 1.0, %v1801_v58  ;;  %1810 = vtanh.f32 %v1141_v57  ;;  %v1101_v63 = vadd.f32 %v1660_v61, %v2201_v35  ;;  %v1095_v0 = vpop.f32.mrb[19].mxu1 }
 0x2ab   : > { %v1183_v1 = vmul.f32 0.5, %v1167_v59  ;;  %1812 = vtanh.f32 %v1140_v60  ;;  %v1096_v2 = vadd.f32 %v2201_v35, %v1095_v0 }
 0x2ac   : > { %v1803_v3 = vpop.eup %1802  ;;  %v1182_v4 = vmul.f32 0.5, %v1166_v62  ;;  %v1143_v5 = vmul.f32 0.5, %v1101_v63 }
 0x2ad   : > { %v1805_v6 = vpop.eup %1804  ;;  %1216 = vst.msk [vmem:[%s2215_s30 + $0x8] sm:$0xff] %vm404_vm0, %v1183_v1  ;;  %v1169_v7 = vadd.f32 1.0, %v1803_v3  ;;  %v1142_v8 = vmul.f32 0.5, %v1096_v2  ;;  %v1663_v10 = vpop.f32.mrb[20].mxu1 }
 0x2ae   : > { %1215 = vst.msk [vmem:[%s2215_s30] sm:$0xff] %vm404_vm0, %v1182_v4  ;;  %v1168_v11 = vadd.f32 1.0, %v1805_v6  ;;  %1814 = vtanh.f32 %v1143_v5  ;;  %v1111_v12 = vadd.f32 %v1663_v10, %v2201_v35  ;;  %v1105_v13 = vpop.f32.mrb[21].mxu1 }
 0x2af   : > { %v1185_v9 = vmul.f32 0.5, %v1169_v7  ;;  %1816 = vtanh.f32 %v1142_v8  ;;  %v1106_v14 = vadd.f32 %v2201_v35, %v1105_v13 }
 0x2b0   : > { %v1807_v17 = vpop.eup %1806  ;;  %v1184_v18 = vmul.f32 0.5, %v1168_v11  ;;  %v1145_v19 = vmul.f32 0.5, %v1111_v12 }
 0x2b1   : > { %v1809_v20 = vpop.eup %1808  ;;  %1218 = vst.msk [vmem:[%s2215_s30 + $0x18] sm:$0xff] %vm404_vm0, %v1185_v9  ;;  %v1171_v21 = vadd.f32 1.0, %v1807_v17  ;;  %v1144_v22 = vmul.f32 0.5, %v1106_v14  ;;  %v1666_v23 = vpop.f32.mrb[22].mxu1 }
 0x2b2   : > { %1217 = vst.msk [vmem:[%s2215_s30 + $0x10] sm:$0xff] %vm404_vm0, %v1184_v18  ;;  %v1170_v24 = vadd.f32 1.0, %v1809_v20  ;;  %1818 = vtanh.f32 %v1145_v19  ;;  %v1121_v25 = vadd.f32 %v1666_v23, %v2201_v35  ;;  %v1115_v26 = vpop.f32.mrb[23].mxu1 }
 0x2b3   : > { %v1187_v27 = vmul.f32 0.5, %v1171_v21  ;;  %1820 = vtanh.f32 %v1144_v22  ;;  %v1116_v28 = vadd.f32 %v2201_v35, %v1115_v26 }
 0x2b4   : > { %v1811_v29 = vpop.eup %1810  ;;  %v1186_v30 = vmul.f32 0.5, %v1170_v24  ;;  %v1147_v31 = vmul.f32 0.5, %v1121_v25 }
 0x2b5   : > { %v1813_v32 = vpop.eup %1812  ;;  %1220 = vst.msk [vmem:[%s2215_s30 + $0x28] sm:$0xff] %vm404_vm0, %v1187_v27  ;;  %v1173_v33 = vadd.f32 1.0, %v1811_v29  ;;  %v1146_v34 = vmul.f32 0.5, %v1116_v28  ;;  %v1669_v36 = vpop.f32.mrb[24].mxu1 }
 0x2b6   : > { %1219 = vst.msk [vmem:[%s2215_s30 + $0x20] sm:$0xff] %vm404_vm0, %v1186_v30  ;;  %v1172_v15 = vadd.f32 1.0, %v1813_v32  ;;  %1822 = vtanh.f32 %v1147_v31  ;;  %v1131_v37 = vadd.f32 %v1669_v36, %v2201_v35  ;;  %v1125_v16 = vpop.f32.mrb[25].mxu1 }
 0x2b7   : > { %v1189_v38 = vmul.f32 0.5, %v1173_v33  ;;  %1824 = vtanh.f32 %v1146_v34  ;;  %v1126_v39 = vadd.f32 %v2201_v35, %v1125_v16 }
 0x2b8   : > { %v1815_v40 = vpop.eup %1814  ;;  %v1188_v41 = vmul.f32 0.5, %v1172_v15  ;;  %v1149_v42 = vmul.f32 0.5, %v1131_v37 }
 0x2b9   : > { %v1817_v43 = vpop.eup %1816  ;;  %1222 = vst.msk [vmem:[%s2215_s30 + $0x38] sm:$0xff] %vm404_vm0, %v1189_v38  ;;  %v1175_v44 = vadd.f32 1.0, %v1815_v40  ;;  %v1148_v45 = vmul.f32 0.5, %v1126_v39 }
 0x2ba   : > { %1221 = vst.msk [vmem:[%s2215_s30 + $0x30] sm:$0xff] %vm404_vm0, %v1188_v41  ;;  %v1174_v46 = vadd.f32 1.0, %v1817_v43  ;;  %1826 = vtanh.f32 %v1149_v42 }
 0x2bb   : > { %v1191_v47 = vmul.f32 0.5, %v1175_v44  ;;  %1828 = vtanh.f32 %v1148_v45 }
 0x2bc   : > { %v1819_v48 = vpop.eup %1818  ;;  %v1190_v35 = vmul.f32 0.5, %v1174_v46 }
 0x2bd   : > { %v1821_v49 = vpop.eup %1820  ;;  %1224 = vst.msk [vmem:[%s2215_s30 + $0x48] sm:$0xff] %vm404_vm0, %v1191_v47  ;;  %v1177_v50 = vadd.f32 1.0, %v1819_v48 }
 0x2be   : > { %1223 = vst.msk [vmem:[%s2215_s30 + $0x40] sm:$0xff] %vm404_vm0, %v1190_v35  ;;  %v1176_v51 = vadd.f32 1.0, %v1821_v49 }
 0x2bf   : > { %v1193_v52 = vmul.f32 0.5, %v1177_v50 }
 0x2c0   : > { %v1823_v53 = vpop.eup %1822  ;;  %v1192_v54 = vmul.f32 0.5, %v1176_v51 }
 0x2c1   : > { %v1825_v55 = vpop.eup %1824  ;;  %1226 = vst.msk [vmem:[%s2215_s30 + $0x58] sm:$0xff] %vm404_vm0, %v1193_v52  ;;  %v1179_v56 = vadd.f32 1.0, %v1823_v53 }
 0x2c2   : > { %1225 = vst.msk [vmem:[%s2215_s30 + $0x50] sm:$0xff] %vm404_vm0, %v1192_v54  ;;  %v1178_v57 = vadd.f32 1.0, %v1825_v55 }
 0x2c3   : > { %v1195_v58 = vmul.f32 0.5, %v1179_v56 }
 0x2c4   : > { %v1827_v59 = vpop.eup %1826  ;;  %v1194_v60 = vmul.f32 0.5, %v1178_v57 }
 0x2c5   : > { %v1829_v61 = vpop.eup %1828  ;;  %1228 = vst.msk [vmem:[%s2215_s30 + $0x68] sm:$0xff] %vm404_vm0, %v1195_v58  ;;  %v1181_v62 = vadd.f32 1.0, %v1827_v59 }
 0x2c6   : > { %1227 = vst.msk [vmem:[%s2215_s30 + $0x60] sm:$0xff] %vm404_vm0, %v1194_v60  ;;  %v1180_v63 = vadd.f32 1.0, %v1829_v61 }
 0x2c7   : > { %v1197_v0 = vmul.f32 0.5, %v1181_v62 }
 0x2c8   : > { %v1196_v1 = vmul.f32 0.5, %v1180_v63 }
 0x2c9   : > { %1230 = vst.msk [vmem:[%s2215_s30 + $0x78] sm:$0xff] %vm404_vm0, %v1197_v0 }
 0x2ca   : > { %1229 = vst.msk [vmem:[%s2215_s30 + $0x70] sm:$0xff] %vm404_vm0, %v1196_v1 }
 0x2cb PF: > { %s21_s13 = sadd.s32 1, %s1836_s13  }
 0x2cc   : > { %p18_p4 = scmp.ge.s32.totalorder %s21_s13, 6  }
 0x2ce   :  { %20 = sbr.rel (!%p18_p4) target bundleno = 1 (0x1), region = 98 }

</bundles_post_ra>
